<compile_context>
chip_gen: v7x
topology: tpu7x:2x2x1
jax: 0.10.0
libtpu: 0.0.40
codegen_flags: <defaults>
</compile_context>

<pallas_src>
import functools
import math

import jax
import jax.numpy as jnp
from jax.experimental import pallas as pl
from jax.experimental.pallas import tpu as pltpu

EPS = 1e-4  # matches normalize(..., eps=0.0001)


def _round_up(x, m):
    return ((x + m - 1) // m) * m


def _cdiv(a, b):
    return (a + b - 1) // b


def _vmem_budget_bytes():
    """~75% of per-core VMEM (headroom for compiler scratch / semaphores)."""
    cap = None
    try:
        cap = int(pltpu.get_tpu_info().vmem_capacity_bytes)
    except Exception:
        cap = None
    if cap is None:
        cap = 128 << 20                                   # v5e / v6e physical
        try:
            if "v7" in jax.devices()[0].device_kind.lower():
                cap = 64 << 20                            # v7x has 64 MiB per TC
        except Exception:
            pass
    return (cap * 3) // 4


def _is_v5e():
    try:
        kind = jax.devices()[0].device_kind.lower()
        return ("v5 lite" in kind) or ("v5e" in kind) or ("v5litepod" in kind)
    except Exception:
        return False


def mp_normalize_kernel(w_ref, o_ref, *, sqrt_fan_in):
    """Per-out-channel magnitude-preserving normalization, one 128-column block.

    w_ref: (K, 128) fp32 raw weights (rows ordered (kh, kw, ci), cols = out channels).
    o_ref: (K, 128) bf16 normalized weights  w / (eps*sqrt(fan_in) + ||w_col||_2).
    """
    w = w_ref[...]                                                # fp32
    n = jnp.sqrt(jnp.sum(w * w, axis=0, keepdims=True))           # (1, 128) fp32
    inv = pl.reciprocal(EPS * sqrt_fan_in + n, approx=False)      # one reciprocal/channel
    o_ref[...] = (w * inv).astype(o_ref.dtype)                    # zero cols stay zero


def mp_conv_tap_kernel(x_ref, w_ref, o_ref, *, KH, KW, tho, wo_pad):
    """Fused conv tile: unrolled (kh, kw) tap loop over a halo'd row block.

    x_ref: (1, tho+KH-1, Wp_pad, C_in)  bf16 input rows (with KH-1 halo rows)
    w_ref: (KH*KW, C_in, tn)            bf16 normalized weights (per-tap RHS slices)
    o_ref: (1, tho*wo_pad, tn)          bf16 dense (stride-1) output tile
    """
    cin = x_ref.shape[-1]
    tn = o_ref.shape[-1]
    acc = jnp.zeros((tho * wo_pad, tn), jnp.float32)
    for kh in range(KH):                       # static unrolled tap loop (KH*KW small)
        for kw in range(KW):
            xs = x_ref[0, kh:kh + tho, kw:kw + wo_pad, :]          # (tho, wo_pad, cin)
            xs = xs.reshape(tho * wo_pad, cin)                     # wo_pad % 16 == 0
            acc = acc + jnp.dot(xs, w_ref[kh * KW + kw],
                                preferred_element_type=jnp.float32)
    o_ref[0] = acc.astype(o_ref.dtype)


def mp_conv2d(x, weight, stride=(1, 1), padding=(0, 0), *, compute_dtype=jnp.bfloat16):
    """x: (B, C_in, H, W) NCHW, weight: (C_out, C_in, KH, KW). Returns NCHW output."""
    B, C_in, H, W = x.shape
    C_out, _, KH, KW = weight.shape
    sh, sw = stride
    ph, pw = padding

    # Dense (stride-1) output extents; a strided output is a subsample of the dense one.
    Hp, Wp = H + 2 * ph, W + 2 * pw
    HO, WO = Hp - KH + 1, Wp - KW + 1
    assert HO >= 1 and WO >= 1, "kernel larger than (padded) input"
    HO_s, WO_s = (Hp - KH) // sh + 1, (Wp - KW) // sw + 1

    K = KH * KW * C_in
    C_out_pad = _round_up(C_out, 128)            # lane-dense output columns
    WO_pad = _round_up(WO, 16)                   # sublane-aligned rows for bf16 tiles
    Wp_pad = WO_pad + KW - 1

    vmem_budget = _vmem_budget_bytes()

    # C_out tile: 256 matches the v6e/v7x 2x256^2 MXU; 128 on v5e / small layers.
    tn = 256 if (C_out_pad % 256 == 0 and not _is_v5e()) else 128
    NB = C_out_pad // tn

    cin_lane = _round_up(C_in, 128)              # VMEM lane padding of the minor dim

    def _tile_bytes(t):
        x_t = (t + KH - 1) * Wp_pad * cin_lane * 2     # bf16 input tile (+halo)
        o_t = t * WO_pad * tn * 2                      # bf16 output tile
        w_t = KH * KW * cin_lane * tn * 2              # bf16 weight block
        acc = t * WO_pad * tn * 4                      # fp32 accumulator temporaries
        return 2 * (x_t + o_t + w_t) + acc             # double-buffered pipeline bufs

    # Rows of dense output per tile: big tiles amortize the ~0.35us per-step overhead.
    tho = max(1, min(HO, max(1, 1024 // WO_pad)))
    while tho > 1 and _tile_bytes(tho) > vmem_budget:
        tho = max(1, tho // 2)
    # >=2 steps on the parallel M axis so v7x's two TensorCores both get work.
    if B * _cdiv(HO, tho) < 2 and HO >= 2:
        tho = _cdiv(HO, 2)

    HB = _cdiv(HO, tho)
    HO_pad = HB * tho
    THALO = tho + KH - 1
    Hp_need = HO_pad + KH - 1
    MB = B * HB
    M_flat = tho * WO_pad

    # --- glue: NHWC, cast to bf16 FIRST, single fused pad (conv pad + alignment) ---
    x_nhwc = jnp.transpose(x, (0, 2, 3, 1)).astype(compute_dtype)
    x_nhwc = jnp.pad(
        x_nhwc,
        ((0, 0), (ph, ph + Hp_need - Hp), (pw, pw + Wp_pad - Wp), (0, 0)))
    # Overlapping row blocks with a (KH-1)-row halo: ~(tho+KH-1)/tho input inflation
    # instead of the KH*KW inflation of a materialized im2col matrix.
    x_blk = jnp.stack(
        [x_nhwc[:, hb * tho: hb * tho + THALO] for hb in range(HB)], axis=1)
    x_blk = x_blk.reshape(MB, THALO, Wp_pad, C_in)

    # --- weights: (C_out,C_in,KH,KW) -> (K, C_out_pad), rows ordered (kh, kw, ci) ---
    w_t = jnp.transpose(weight, (2, 3, 1, 0)).reshape(K, C_out).astype(jnp.float32)
    w_t = jnp.pad(w_t, ((0, 0), (0, C_out_pad - C_out)))

    # --- kernel 1: one-shot normalization, tiled over 128-column blocks of C_out ---
    norm_vmem = int(min(max(6 * K * 128 * 4, 4 << 20), vmem_budget))
    w_hat = pl.pallas_call(
        functools.partial(mp_normalize_kernel, sqrt_fan_in=math.sqrt(float(K))),
        out_shape=jax.ShapeDtypeStruct((K, C_out_pad), compute_dtype),
        grid_spec=pltpu.PrefetchScalarGridSpec(
            num_scalar_prefetch=0,
            grid=(C_out_pad // 128,),
            in_specs=[pl.BlockSpec((K, 128), lambda j: (0, j))],
            out_specs=pl.BlockSpec((K, 128), lambda j: (0, j))),
        compiler_params=pltpu.CompilerParams(
            dimension_semantics=("parallel",),
            vmem_limit_bytes=norm_vmem),
    )(w_t)
    w_hat = w_hat.reshape(KH * KW, C_in, C_out_pad)    # per-tap (C_in, C_out_pad) RHS

    # --- kernel 2: fused conv, grid over (row blocks, C_out blocks), taps in-kernel ---
    flops = int(2 * MB * M_flat * K * C_out_pad)
    bytes_accessed = int(int(x_blk.size) * 2
                         + (K * C_out_pad * 2) * (1 if NB == 1 else MB)
                         + MB * M_flat * C_out_pad * 2)
    vmem_limit = int(max(min(_tile_bytes(tho) + (8 << 20), vmem_budget), 16 << 20))

    out = pl.pallas_call(
        functools.partial(mp_conv_tap_kernel, KH=KH, KW=KW, tho=tho, wo_pad=WO_pad),
        out_shape=jax.ShapeDtypeStruct((MB, M_flat, C_out_pad), compute_dtype),
        grid_spec=pltpu.PrefetchScalarGridSpec(
            num_scalar_prefetch=0,
            grid=(MB, NB),
            in_specs=[
                pl.BlockSpec((1, THALO, Wp_pad, C_in), lambda m, n: (m, 0, 0, 0)),
                pl.BlockSpec((KH * KW, C_in, tn), lambda m, n: (0, 0, n)),
            ],
            out_specs=pl.BlockSpec((1, M_flat, tn), lambda m, n: (m, 0, n))),
        compiler_params=pltpu.CompilerParams(
            dimension_semantics=("parallel", "parallel"),
            vmem_limit_bytes=vmem_limit),
        cost_estimate=pl.CostEstimate(flops=flops, transcendentals=0,
                                      bytes_accessed=bytes_accessed),
    )(x_blk, w_hat)

    # --- glue: un-pad, subsample for stride, NCHW + original dtype (module contract) ---
    out = out.reshape(B, HO_pad, WO_pad, C_out_pad)[:, :HO, :WO, :C_out]
    if sh != 1 or sw != 1:
        out = out[:, ::sh, ::sw, :]
    out = jnp.transpose(out, (0, 3, 1, 2)).astype(x.dtype)
    assert out.shape == (B, C_out, HO_s, WO_s), out.shape
    return out


if __name__ == "__main__":
    key = jax.random.PRNGKey(0)
    kx, kw = jax.random.split(key)

    B, C_in, H, W = 2, 4, 16, 16
    C_out, KH, KW = 8, 3, 3

    x = jax.random.normal(kx, (B, C_in, H, W), dtype=jnp.float32)
    # deterministic stand-in for nn.Parameter(torch.randn(C_out, C_in, KH, KW))
    weight = jax.random.normal(kw, (C_out, C_in, KH, KW), dtype=jnp.float32)

    # --- plain-JAX fp32 reference of the same forward semantics ---
    fan_in = C_in * KH * KW
    n = jnp.sqrt(jnp.sum(weight.astype(jnp.float32) ** 2, axis=(1, 2, 3), keepdims=True))
    w_hat_ref = weight / (EPS * jnp.sqrt(jnp.float32(fan_in)) + n)

    # case 1: module defaults (stride 1, no padding)
    out = jax.block_until_ready(mp_conv2d(x, weight, stride=(1, 1), padding=(0, 0)))
    ref = jax.lax.conv_general_dilated(
        x, w_hat_ref, window_strides=(1, 1), padding="VALID",
        dimension_numbers=("NCHW", "OIHW", "NCHW"))
    assert out.shape == (B, C_out, H - KH + 1, W - KW + 1), out.shape
    err = float(jnp.max(jnp.abs(out - ref)))
    # bf16 MXU operands / bf16 writeback (fp32 norm + fp32 accumulation) -> loose tol
    assert jnp.allclose(out, ref, atol=5e-2, rtol=5e-2), err

    # case 2: strided, padded conv (exercises padding + the stride subsample glue)
    out2 = jax.block_until_ready(mp_conv2d(x, weight, stride=(2, 2), padding=(1, 1)))
    ref2 = jax.lax.conv_general_dilated(
        x, w_hat_ref, window_strides=(2, 2), padding=((1, 1), (1, 1)),
        dimension_numbers=("NCHW", "OIHW", "NCHW"))
    assert out2.shape == ref2.shape, (out2.shape, ref2.shape)
    err2 = float(jnp.max(jnp.abs(out2 - ref2)))
    assert jnp.allclose(out2, ref2, atol=5e-2, rtol=5e-2), err2

    print("KERNEL_OK")
</pallas_src>

<mosaic_0001>
module attributes {stable_mosaic.version = 11 : i64} {
  func.func @mp_normalize_kernel(%arg0: i32, %arg1: memref<36x128xf32, #tpu.memory_space<vmem>>, %arg2: memref<36x128xbf16, #tpu.memory_space<vmem>>) attributes {dimension_semantics = [#tpu.dimension_semantics<parallel>], iteration_bounds = array<i64: 1>, scalar_prefetch = 0 : i64, scratch_operands = 0 : i64, tpu.core_type = #tpu.core_type<tc>, window_params = [{transform_indices = @transform_0, window_bounds = array<i64: 36, 128>}, {transform_indices = @transform_1, window_bounds = array<i64: 36, 128>}]} {
    %c0 = arith.constant 0 : index
    %c0_0 = arith.constant 0 : index
    %0 = vector.load %arg1[%c0, %c0_0] : memref<36x128xf32, #tpu.memory_space<vmem>>, vector<36x128xf32>
    %1 = arith.mulf %0, %0 : vector<36x128xf32>
    %cst = arith.constant dense<0.000000e+00> : vector<128xf32>
    %2 = vector.multi_reduction <add>, %1, %cst [0] : vector<36x128xf32> to vector<128xf32>
    %3 = vector.shape_cast %2 : vector<128xf32> to vector<1x128xf32>
    %4 = math.sqrt %3 : vector<1x128xf32>
    %cst_1 = arith.constant 6.000000e-04 : f32
    %5 = vector.broadcast %cst_1 : f32 to vector<1x128xf32>
    %6 = arith.addf %5, %4 : vector<1x128xf32>
    %7 = tpu.reciprocal %6 : vector<1x128xf32> -> vector<1x128xf32>
    %8 = vector.broadcast %7 : vector<1x128xf32> to vector<36x128xf32>
    %9 = arith.mulf %0, %8 : vector<36x128xf32>
    %10 = arith.truncf %9 : vector<36x128xf32> to vector<36x128xbf16>
    %c0_2 = arith.constant 0 : index
    %c0_3 = arith.constant 0 : index
    %11 = vector.load %arg2[%c0_2, %c0_3] : memref<36x128xbf16, #tpu.memory_space<vmem>>, vector<36x128xbf16>
    tpu.vector_store %arg2[%c0_2, %c0_3], %10 {strides = array<i32>} : memref<36x128xbf16, #tpu.memory_space<vmem>>, vector<36x128xbf16>,
    return
  }
  func.func @transform_0(%arg0: i32) -> (i32, i32) {
    %c0_i32 = arith.constant 0 : i32
    %c0_i32_0 = arith.constant 0 : i32
    return %c0_i32, %arg0 : i32, i32
  }
  func.func @transform_1(%arg0: i32) -> (i32, i32) {
    %c0_i32 = arith.constant 0 : i32
    %c0_i32_0 = arith.constant 0 : i32
    return %c0_i32, %arg0 : i32, i32
  }
}

</mosaic_0001>

<bundles_post_ra>
// kernel: tpu_custom_call.1
= control target key start
LH: loop header
LB: loop body
LE: loop exit
PB: predicated region body
PF: predicated region fallthrough
CT: control target
= control target key end

     0   :  { %6 = vsyncpa [#allocation3], 0  ;;  %s221_s0 = inlined_call_operand.hbm [shape: f32[36,128], index: 0, kind: input, shape index: {}]   ;;  %s222_s1 = inlined_call_operand.hbm [shape: bf16[36,128], index: 1, kind: output, shape index: {}]  }
   0x1   :  { %7 = vsyncpa [#allocation4], 0  ;;  %s181_s6 = smov [#allocation2]   ;;  %s133_s10 = scalar_lea.hbm %s221_s0, 640 }
   0x2   :  { %s13_s7 = sshll.u32 %s181_s6, 4  ;;  %p134_p0 = scmp.ne.s32.totalorder %s221_s0, %s133_s10  ;;  %s14_s7 = int_to_ptr.vmem [resolvable:$true] %s13_s7 }
   0x3   :  { %p137_p1 = scmp.lt.u32.totalorder %s133_s10, %s221_s0 }
   0x5   :  { %p139_p2 = pnand %p137_p1, %p134_p0 }
   0x7   :  { %142 = shalt.err (!%p139_p2)
}
   0x8   :  { %s143_s15 = scalar_lea.vmem %s14_s7, 640  ;;  %p148_p4 = scmp.lt.s32.totalorder %s14_s7, %s14_s7 }
   0x9   :  { %p144_p3 = scmp.ne.s32.totalorder %s14_s7, %s143_s15  ;;  %p149_p5 = scmp.lt.s32.totalorder %s143_s15, %s143_s15 }
   0xb   :  { %p150_p6 = por %p149_p5, %p148_p4 }
   0xd   :  { %p151_p7 = pnand %p150_p6, %p144_p3 }
   0xf   :  { %154 = shalt.err (!%p151_p7)
}
  0x10   :  { %s182_s16 = smov 128   ;;  %s183_s17 = smov 8  }
  0x11   :  { %19 = dma.hbm_to_vmem [thread:$0]  %s221_s0, 640, %s14_s7, [#allocation3], %s182_s16, %s182_s16, %s183_s17  }
  0x12   :  { %177 = dma.done.wait [#allocation3], 640  }
  0x13   :  { %178 = vsyncadd [#allocation3], 4294966656  ;;  %v23_v0 = vld [vmem:[#allocation2] sm:$0xff]  ;;  %v24_v1 = vld [vmem:[#allocation2 + $0x8] sm:$0xff]  ;;  %vm36_vm0 = vcmask 1043456   ;;  %s184_s0 = smov [#allocation5]  }
  0x14   :  { %v25_v2 = vld [vmem:[#allocation2 + $0x10] sm:$0xff]  ;;  %v26_v3 = vld [vmem:[#allocation2 + $0x18] sm:$0xff]  ;;  %v27_v4 = vld [vmem:[#allocation2 + $0x20] sm:$0xf]  ;;  %v28_v5 = vmul.f32 %v23_v0, %v23_v0  ;;  %v29_v6 = vmul.f32 %v24_v1, %v24_v1  ;;  %s90_s20 = sshll.u32 %s184_s0, 4  ;;  %s91_s20 = int_to_ptr.vmem [resolvable:$true] %s90_s20 }
  0x15   :  { %v30_v7 = vmul.f32 %v25_v2, %v25_v2  ;;  %v32_v8 = vmul.f32 %v27_v4, %v27_v4  ;;  %v31_v9 = vmul.f32 %v26_v3, %v26_v3  ;;  %s155_s21 = scalar_lea.vmem %s91_s20, 320  ;;  %p160_p9 = scmp.lt.s32.totalorder %s91_s20, %s91_s20 }
  0x16   :  { %v33_v10 = vadd.f32 %v29_v6, %v28_v5  ;;  %p156_p8 = scmp.ne.s32.totalorder %s91_s20, %s155_s21  ;;  %p161_p10 = scmp.lt.s32.totalorder %s155_s21, %s155_s21 }
  0x17   :  { %v37_v12 = vsel %vm36_vm0, %v32_v8, 0.0 }
  0x18   :  { %v34_v11 = vadd.f32 %v33_v10, %v30_v7  ;;  %p162_p11 = por %p161_p10, %p160_p9 }
  0x1a   :  { %v35_v13 = vadd.f32 %v34_v11, %v31_v9  ;;  %p163_p12 = pnand %p162_p11, %p156_p8 }
  0x1c   :  { %v38_v14 = vadd.f32 %v37_v12, %v35_v13 }
  0x1e   :  { %v39_v15 = vrot.slane %v38_v14, 4 }
  0x20   :  { %v40_v16 = vadd.f32 %v39_v15, %v38_v14 }
  0x22   :  { %v41_v17 = vrot.slane %v40_v16, 2 }
  0x24   :  { %v42_v18 = vadd.f32 %v41_v17, %v40_v16 }
  0x26   :  { %v43_v19 = vrot.slane %v42_v18, 1 }
  0x28   :  { %v44_v20 = vadd.f32 %v43_v19, %v42_v18 }
  0x2a   :  { %129 = vrsqrt.f32 %v44_v20  ;;  %vm47_vm1 = vcmp.eq.f32.partialorder %v44_v20, inf  ;;  %v50_v22 = vand.u32 2147483648, %v44_v20  ;;  %vm49_vm2 = vcmp.eq.f32.partialorder %v44_v20, 0.0 }
  0x34   :  { %v130_v21 = vpop.eup %129 }
  0x35   :  { %v46_v23 = vmul.f32 %v130_v21, %v44_v20 }
  0x37   :  { %v48_v24 = vsel %vm47_vm1, %v44_v20, %v46_v23 }
  0x38   :  { %v51_v25 = vsel %vm49_vm2, %v50_v22, %v48_v24 }
  0x39   :  { %v52_v26 = vadd.f32 0.0006, %v51_v25 }
  0x3b   :  { %131 = vrcp.f32 %v52_v26 }
  0x45   :  { %v132_v27 = vpop.eup %131 }
  0x46   :  { %v54_v28 = vmul.f32 %v132_v27, %v23_v0  ;;  %v55_v29 = vmul.f32 %v132_v27, %v24_v1  ;;  %v56_v30 = vmul.f32 %v132_v27, %v25_v2  ;;  %v57_v31 = vmul.f32 %v132_v27, %v26_v3 }
  0x47   :  { %v58_v32 = vmul.f32 %v132_v27, %v27_v4 }
  0x48   :  { %v115_v33 = vpack.c.bf16 %v55_v29, %v54_v28  ;;  %v120_v34 = vpack.c.bf16 %v57_v31, %v56_v30 }
  0x49   :  { %v111_v35 = vpack.c.bf16 %v58_v32, %v58_v32 }
  0x4a   :  { %116 = vst [vmem:[#allocation5] sm:$0xff] %v115_v33   ;;  %122 = vst [vmem:[#allocation5 + $0x8] sm:$0xff] %v120_v34  }
  0x4b   :  { %84 = vst [vmem:[#allocation5 + $0x10] sm:$0x3] %v111_v35 }
  0x4c   :  { %166 = shalt.err (!%p163_p12)
}
  0x4d   :  { %s167_s24 = scalar_lea.hbm %s222_s1, 320 }
  0x4e   :  { %p168_p13 = scmp.ne.s32.totalorder %s222_s1, %s167_s24  ;;  %p171_p0 = scmp.lt.u32.totalorder %s167_s24, %s222_s1 }
  0x50   :  { %p173_p1 = pnand %p171_p0, %p168_p13 }
  0x52   :  { %176 = shalt.err (!%p173_p1)
}
  0x53   :  { %s185_s29 = smov 64   ;;  %s186_s30 = smov 4  }
  0x54   :  { %96 = dma.vmem_to_hbm [thread:$0]  %s91_s20, 320, %s222_s1, [#allocation4], %s185_s29, %s185_s29, %s186_s30  }
  0x55   :  { %179 = dma.done.wait [#allocation4], 320  }
  0x56   :  { %180 = vsyncadd [#allocation4], 4294966976 }
  0x57   :  { %100 = vsyncpa [#allocation3], 1 }
  0x58   :  { %101 = vsyncpa [#allocation4], 1 }

</bundles_post_ra>
